<compile_context>
chip_gen: v6e
topology: v6e:2x2x1
jax: 0.10.0
libtpu: 0.0.40
codegen_flags: <defaults>
</compile_context>

<pallas_src>
import functools
import math

import jax
import jax.numpy as jnp
from jax.experimental import pallas as pl
from jax.experimental.pallas import tpu as pltpu


def _ceil_div(a, b):
    return (a + b - 1) // b


def _round_up(x, m):
    return _ceil_div(x, m) * m


def _split_axis(dim, tile_max, granule):
    """Pick (tile, n_tiles, padded_dim) with tile a multiple of `granule`,
    tile <= ~tile_max, and the padding derived from the tile COUNT (so e.g.
    B=520, tile_max=512 gives 2 tiles of 264 rows, not 2x512)."""
    aligned = _round_up(max(int(dim), 1), granule)
    tile_max = max(granule, _round_up(min(int(tile_max), aligned), granule))
    n = _ceil_div(aligned, tile_max)
    tile = _round_up(_ceil_div(aligned, n), granule)
    n = _ceil_div(aligned, tile)
    return tile, n, tile * n


def _vmem_limit_bytes():
    """Generation-aware scoped-VMEM limit (v5e/v6e: 128 MiB physical, v7x: 64 MiB)."""
    try:
        cap = int(pltpu.get_tpu_info().vmem_capacity_bytes)
    except Exception:
        cap = 64 * 1024 * 1024  # conservative fallback: fits every generation
    return max(32 * 1024 * 1024, min(100 * 1024 * 1024, (cap * 3) // 4))


def _deconf_kernel(x_ref, w_ref, o_ref, *, inv_f):
    """Grid = (B tiles, C tiles, F tiles); F (k, innermost) is the reduction axis.

    o_ref (f32) doubles as the accumulator: its block index is constant across k,
    so the block stays resident in VMEM for the whole k loop.
    """
    k = pl.program_id(2)

    @pl.when(k == 0)
    def _():
        o_ref[...] = jnp.zeros_like(o_ref)

    x = x_ref[...]                                               # (tm, tk) bf16/f32
    w = w_ref[...]                                               # (tk, tn) bf16/f32

    # MXU cross term; the per-k partial norms are cheap VPU/XLU filler under it.
    xw = jnp.dot(x, w, preferred_element_type=jnp.float32)      # (tm, tn) f32
    xf = x.astype(jnp.float32)
    wf = w.astype(jnp.float32)
    xsq = jnp.sum(xf * xf, axis=1, keepdims=True)                # (tm, 1)  f32
    wsq = jnp.sum(wf * wf, axis=0, keepdims=True)                # (1, tn)  f32

    # Accumulate the k-partial of (||x||^2 - 2 x.w + ||w||^2); scale/negate last.
    o_ref[...] += (xsq - 2.0 * xw) + wsq

    @pl.when(k == pl.num_programs(2) - 1)
    def _():
        o_ref[...] = o_ref[...] * (-inv_f)


def euclidean_deconf(x, w, *, tm=1024, tn=512, tk=1024,
                     compute_dtype=jnp.bfloat16):
    """x: (B, F), w: (F, C)  ->  (B, C) float32 with out[b,c] = -mean_f (x-w)^2.

    Zero-padding the F axis is exact (padded features contribute 0 to every term
    and the mean divides by the true F); padded B rows / C cols are sliced off.
    """
    B, F = x.shape
    F2, C = w.shape
    assert F == F2, (F, F2)

    compute_dtype = jnp.dtype(compute_dtype)
    itemsize = compute_dtype.itemsize

    vmem_limit = _vmem_limit_bytes()
    budget = (vmem_limit * 3) // 4  # headroom for compiler scratch

    tm_max, tn_max, tk_max = int(tm), int(tn), int(tk)
    while True:
        tm_t, n_i, B_pad = _split_axis(B, tm_max, 8)
        tn_t, n_j, C_pad = _split_axis(C, tn_max, 128)
        tk_t, n_k, F_pad = _split_axis(F, tk_max, 128)
        # Double-buffered footprint: x + w inputs (compute dtype) + f32 output.
        footprint = 2 * (tm_t * tk_t * itemsize
                         + tk_t * tn_t * itemsize
                         + tm_t * tn_t * 4)
        if footprint <= budget or (tk_max <= 128 and tm_max <= 8 and tn_max <= 128):
            break
        if tk_max > 128:
            tk_max = max(128, tk_max // 2)
        elif tm_max > 8:
            tm_max = max(8, tm_max // 2)
        else:
            tn_max = max(128, tn_max // 2)

    # v7x has 2 TensorCores: if both "parallel" axes collapsed to a single tile
    # and the batch is large, split it so the second core gets work (the extra
    # grid step is negligible on 1-TC v5e/v6e at these sizes).
    if n_i == 1 and n_j == 1 and B_pad >= 256:
        tm_t, n_i, B_pad = _split_axis(B, max(8, B_pad // 2), 8)

    tm_t = int(tm_t); tn_t = int(tn_t); tk_t = int(tk_t)

    x_c = x.astype(compute_dtype)
    w_c = w.astype(compute_dtype)
    if (B_pad, F_pad) != (B, F):
        x_c = jnp.pad(x_c, ((0, B_pad - B), (0, F_pad - F)))
    if (F_pad, C_pad) != (F, C):
        w_c = jnp.pad(w_c, ((0, F_pad - F), (0, C_pad - C)))

    grid = (n_i, n_j, n_k)
    kernel = functools.partial(_deconf_kernel, inv_f=1.0 / float(F))

    out = pl.pallas_call(
        kernel,
        out_shape=jax.ShapeDtypeStruct((B_pad, C_pad), jnp.float32),
        grid_spec=pltpu.PrefetchScalarGridSpec(
            num_scalar_prefetch=0,
            grid=grid,
            in_specs=[
                pl.BlockSpec((tm_t, tk_t), lambda i, j, k: (i, k)),   # x
                pl.BlockSpec((tk_t, tn_t), lambda i, j, k: (k, j)),   # w
            ],
            out_specs=pl.BlockSpec((tm_t, tn_t), lambda i, j, k: (i, j)),
        ),
        compiler_params=pltpu.CompilerParams(
            dimension_semantics=("parallel", "parallel", "arbitrary"),
            vmem_limit_bytes=vmem_limit,
        ),
        cost_estimate=pl.CostEstimate(
            flops=2 * B_pad * F_pad * C_pad,
            transcendentals=0,
            bytes_accessed=(itemsize * (n_j * B_pad * F_pad + n_i * F_pad * C_pad)
                            + 4 * B_pad * C_pad),
        ),
    )(x_c, w_c)

    return out[:B, :C]


def init_weight(key, in_features, num_classes):
    # Mirrors nn.init.kaiming_normal_(weight, nonlinearity='relu'):
    # weight shape (num_classes, in_features), fan_in = in_features, std = sqrt(2/fan_in).
    std = math.sqrt(2.0 / in_features)
    return jax.random.normal(key, (num_classes, in_features), jnp.float32) * std


def reference(x, weight):
    # Pure-JAX reference of the PyTorch forward.
    w = weight.T                                   # (F, C)
    diff = x[:, :, None] - w[None, :, :]           # (B, F, C)
    return -jnp.mean(diff * diff, axis=1)          # (B, C)


if __name__ == "__main__":
    key = jax.random.PRNGKey(0)
    k1, k2, k3, k4 = jax.random.split(key, 4)

    # Case 1: the module's toy shape, f32 compute path (single tile after C -> 128).
    B, F, C = 8, 32, 16
    x = jax.random.normal(k1, (B, F), jnp.float32)
    weight = init_weight(k2, F, C)                 # (C, F), like nn.Linear.weight
    out = jax.block_until_ready(
        euclidean_deconf(x, weight.T, compute_dtype=jnp.float32))
    ref = reference(x, weight)
    assert out.shape == (B, C)
    assert jnp.allclose(out, ref, atol=5e-4, rtol=5e-4), "case 1: mismatch vs reference"

    # Case 2: multi-tile grid (exercises k-axis accumulation into o_ref and
    # B/F/C padding) on the default bf16 fast path -> bf16-appropriate tolerance.
    B2, F2, C2 = 24, 300, 40
    x2 = jax.random.normal(k3, (B2, F2), jnp.float32)
    weight2 = init_weight(k4, F2, C2)
    out2 = jax.block_until_ready(
        euclidean_deconf(x2, weight2.T, tm=8, tn=128, tk=128))
    ref2 = reference(x2, weight2)
    assert out2.shape == (B2, C2)
    assert jnp.allclose(out2, ref2, atol=3e-2, rtol=3e-2), "case 2: mismatch vs reference"

    print("KERNEL_OK")
</pallas_src>

<mosaic_0001>
module attributes {stable_mosaic.version = 11 : i64} {
  func.func @_deconf_kernel(%arg0: i32, %arg1: i32, %arg2: i32, %arg3: memref<8x128xf32, #tpu.memory_space<vmem>>, %arg4: memref<128x128xf32, #tpu.memory_space<vmem>>, %arg5: memref<8x128xf32, #tpu.memory_space<vmem>>) attributes {dimension_semantics = [#tpu.dimension_semantics<parallel>, #tpu.dimension_semantics<parallel>, #tpu.dimension_semantics<arbitrary>], iteration_bounds = array<i64: 1, 1, 1>, scalar_prefetch = 0 : i64, scratch_operands = 0 : i64, tpu.core_type = #tpu.core_type<tc>, window_params = [{transform_indices = @transform_0, window_bounds = array<i64: 8, 128>}, {transform_indices = @transform_1, window_bounds = array<i64: 128, 128>}, {transform_indices = @transform_2, window_bounds = array<i64: 8, 128>}]} {
    %c0_i32 = arith.constant 0 : i32
    %0 = arith.cmpi eq, %arg2, %c0_i32 : i32
    %1 = arith.extui %0 : i1 to i32
    %c0_i32_0 = arith.constant 0 : i32
    %2 = arith.cmpi ne, %1, %c0_i32_0 : i32
    scf.if %2 {
      %cst_13 = arith.constant 0.000000e+00 : f32
      %24 = vector.broadcast %cst_13 : f32 to vector<8x128xf32>
      %c0_14 = arith.constant 0 : index
      %c0_15 = arith.constant 0 : index
      %25 = vector.load %arg5[%c0_14, %c0_15] : memref<8x128xf32, #tpu.memory_space<vmem>>, vector<8x128xf32>
      tpu.vector_store %arg5[%c0_14, %c0_15], %24 {strides = array<i32>} : memref<8x128xf32, #tpu.memory_space<vmem>>, vector<8x128xf32>,
    } else {
    }
    %c0 = arith.constant 0 : index
    %c0_1 = arith.constant 0 : index
    %3 = vector.load %arg3[%c0, %c0_1] : memref<8x128xf32, #tpu.memory_space<vmem>>, vector<8x128xf32>
    %c0_2 = arith.constant 0 : index
    %c0_3 = arith.constant 0 : index
    %4 = vector.load %arg4[%c0_2, %c0_3] : memref<128x128xf32, #tpu.memory_space<vmem>>, vector<128x128xf32>
    %cst = arith.constant dense<0.000000e+00> : vector<8x128xf32>
    %5 = tpu.matmul %3, %4, %cst {dimension_numbers = #tpu.dot_dimension_numbers<[1], [0], [0], [1], [0, 0, 1, 1], [], []>} : vector<8x128xf32>, vector<128x128xf32>, vector<8x128xf32> -> vector<8x128xf32>
    %6 = arith.mulf %3, %3 : vector<8x128xf32>
    %cst_4 = arith.constant dense<0.000000e+00> : vector<8xf32>
    %7 = vector.multi_reduction <add>, %6, %cst_4 [1] : vector<8x128xf32> to vector<8xf32>
    %8 = vector.shape_cast %7 : vector<8xf32> to vector<8x1xf32>
    %9 = arith.mulf %4, %4 : vector<128x128xf32>
    %cst_5 = arith.constant dense<0.000000e+00> : vector<128xf32>
    %10 = vector.multi_reduction <add>, %9, %cst_5 [0] : vector<128x128xf32> to vector<128xf32>
    %11 = vector.shape_cast %10 : vector<128xf32> to vector<1x128xf32>
    %c0_6 = arith.constant 0 : index
    %c0_7 = arith.constant 0 : index
    %12 = vector.load %arg5[%c0_6, %c0_7] : memref<8x128xf32, #tpu.memory_space<vmem>>, vector<8x128xf32>
    %cst_8 = arith.constant 2.000000e+00 : f32
    %13 = vector.broadcast %cst_8 : f32 to vector<8x128xf32>
    %14 = arith.mulf %13, %5 : vector<8x128xf32>
    %15 = vector.broadcast %8 : vector<8x1xf32> to vector<8x128xf32>
    %16 = arith.subf %15, %14 : vector<8x128xf32>
    %17 = vector.broadcast %11 : vector<1x128xf32> to vector<8x128xf32>
    %18 = arith.addf %16, %17 : vector<8x128xf32>
    %19 = arith.addf %12, %18 : vector<8x128xf32>
    %c0_9 = arith.constant 0 : index
    %c0_10 = arith.constant 0 : index
    %20 = vector.load %arg5[%c0_9, %c0_10] : memref<8x128xf32, #tpu.memory_space<vmem>>, vector<8x128xf32>
    tpu.vector_store %arg5[%c0_9, %c0_10], %19 {strides = array<i32>} : memref<8x128xf32, #tpu.memory_space<vmem>>, vector<8x128xf32>,
    %c0_i32_11 = arith.constant 0 : i32
    %21 = arith.cmpi eq, %arg2, %c0_i32_11 : i32
    %22 = arith.extui %21 : i1 to i32
    %c0_i32_12 = arith.constant 0 : i32
    %23 = arith.cmpi ne, %22, %c0_i32_12 : i32
    scf.if %23 {
      %c0_13 = arith.constant 0 : index
      %c0_14 = arith.constant 0 : index
      %24 = vector.load %arg5[%c0_13, %c0_14] : memref<8x128xf32, #tpu.memory_space<vmem>>, vector<8x128xf32>
      %cst_15 = arith.constant -3.125000e-02 : f32
      %25 = vector.broadcast %cst_15 : f32 to vector<8x128xf32>
      %26 = arith.mulf %24, %25 : vector<8x128xf32>
      %c0_16 = arith.constant 0 : index
      %c0_17 = arith.constant 0 : index
      %27 = vector.load %arg5[%c0_16, %c0_17] : memref<8x128xf32, #tpu.memory_space<vmem>>, vector<8x128xf32>
      tpu.vector_store %arg5[%c0_16, %c0_17], %26 {strides = array<i32>} : memref<8x128xf32, #tpu.memory_space<vmem>>, vector<8x128xf32>,
    } else {
    }
    return
  }
  func.func @transform_0(%arg0: i32, %arg1: i32, %arg2: i32) -> (i32, i32) {
    %c0_i32 = arith.constant 0 : i32
    return %arg0, %arg2 : i32, i32
  }
  func.func @transform_1(%arg0: i32, %arg1: i32, %arg2: i32) -> (i32, i32) {
    %c0_i32 = arith.constant 0 : i32
    return %arg2, %arg1 : i32, i32
  }
  func.func @transform_2(%arg0: i32, %arg1: i32, %arg2: i32) -> (i32, i32) {
    %c0_i32 = arith.constant 0 : i32
    return %arg0, %arg1 : i32, i32
  }
}

</mosaic_0001>

<bundles_post_ra>
// kernel: tpu_custom_call.1
= control target key start
LH: loop header
LB: loop body
LE: loop exit
PB: predicated region body
PF: predicated region fallthrough
CT: control target
= control target key end

     0   :  { %7 = vsyncpa [#allocation3], 0  ;;  %s391_s0 = inlined_call_operand.hbm [shape: f32[8,128], index: 0, kind: input, shape index: {}]   ;;  %s392_s1 = inlined_call_operand.hbm [shape: f32[128,128], index: 1, kind: input, shape index: {}]   ;;  %s393_s2 = inlined_call_operand.hbm [shape: f32[8,128], index: 2, kind: output, shape index: {}]  }
   0x1   :  { %8 = vsyncpa [#allocation6], 0 }
   0x2   :  { %9 = vsyncpa [#allocation4], 0  ;;  %s323_s9 = smov [#allocation2]   ;;  %s324_s11 = smov [#allocation5]  }
   0x3   :  { %s16_s10 = sshll.u32 %s323_s9, 4  ;;  %s25_s12 = sshll.u32 %s324_s11, 4  ;;  %s17_s10 = int_to_ptr.vmem [resolvable:$true] %s16_s10  ;;  %s26_s12 = int_to_ptr.vmem [resolvable:$true] %s25_s12 }
   0x4   :  { %s265_s13 = scalar_lea.vmem %s17_s10, 128  ;;  %p270_p1 = scmp.lt.s32.totalorder %s17_s10, %s17_s10 }
   0x5   :  { %p266_p0 = scmp.ne.s32.totalorder %s17_s10, %s265_s13  ;;  %p271_p2 = scmp.lt.s32.totalorder %s265_s13, %s265_s13 }
   0x7   :  { %p272_p3 = por %p271_p2, %p270_p1 }
   0x9   :  { %p273_p4 = pnand %p272_p3, %p266_p0 }
   0xb   :  { %276 = shalt.err (!%p273_p4)
}
   0xc   :  { %19 = dma.hbm_to_vmem [thread:$0]  %s391_s0, 128, %s17_s10, [#allocation3]  }
   0xd   :  { %s285_s16 = scalar_lea.vmem %s26_s12, 2048  ;;  %p290_p6 = scmp.lt.s32.totalorder %s26_s12, %s26_s12 }
   0xe   :  { %p286_p5 = scmp.ne.s32.totalorder %s26_s12, %s285_s16  ;;  %p291_p7 = scmp.lt.s32.totalorder %s285_s16, %s285_s16 }
  0x10   :  { %p292_p8 = por %p291_p7, %p290_p6 }
  0x12   :  { %p293_p9 = pnand %p292_p8, %p286_p5 }
  0x14   :  { %296 = shalt.err (!%p293_p9)
}
  0x15   :  { %s325_s17 = smov 128   ;;  %s326_s18 = smov 8  }
  0x16   :  { %31 = dma.hbm_to_vmem [thread:$0]  %s392_s1, 2048, %s26_s12, [#allocation6], %s325_s17, %s325_s17, %s326_s18  }
  0x17   :  { %317 = dma.done.wait [#allocation3], 128  }
  0x18   :  { %318 = vsyncadd [#allocation3], 4294967168 }
  0x19   :  { %319 = dma.done.wait [#allocation6], 2048  }
  0x1a   :  { %320 = vsyncadd [#allocation6], 4294965248  ;;  %v327_v0 = vmov 0.0   ;;  %vm328_vm0 = vmmov 0   ;;  %v353_v1 = vld [vmem:[#allocation5 + $0x78] sm:$0xff]  ;;  %v355_v2 = vld [vmem:[#allocation5 + $0x70] sm:$0xff] }
  0x1b   :  { %215 = vmatprep.subr.mxu0 %v327_v0  ;;  %247 = vmatprep.mubr.msk.f32.mxu0 %vm328_vm0, %v327_v0  ;;  %v359_v3 = vld [vmem:[#allocation5 + $0x68] sm:$0xff]  ;;  %v56_v4 = vld [vmem:[#allocation5 + $0x60] sm:$0xff]  ;;  %v46_v6 = vld [vmem:[#allocation5 + $0x10] sm:$0xff]  ;;  %v147_v45 = vmul.f32 %v355_v2, %v355_v2  ;;  %v148_v46 = vmul.f32 %v353_v1, %v353_v1  ;;  %s329_s0 = smov [#allocation7]  }
  0x1c   :  { %216 = vmatpush3.msra.mxu0 %v353_v1  ;;  %v363_v5 = vld [vmem:[#allocation5 + $0x8] sm:$0xff]  ;;  %v44_v8 = vld [vmem:[#allocation5] sm:$0xff]  ;;  %v43_v9 = vld [vmem:[#allocation2] sm:$0xff]  ;;  %v135_v11 = vmul.f32 %v46_v6, %v46_v6  ;;  %v145_v40 = vmul.f32 %v56_v4, %v56_v4  ;;  %v146_v44 = vmul.f32 %v359_v3, %v359_v3  ;;  %s188_s1 = sshll.u32 %s329_s0, 4  ;;  %s189_s1 = int_to_ptr.vmem [resolvable:$true] %s188_s1 }
  0x1d   :  { %217 = vmatprep.subr.mxu0 %v327_v0  ;;  %v134_v7 = vmul.f32 %v363_v5, %v363_v5  ;;  %v55_v10 = vld [vmem:[#allocation5 + $0x58] sm:$0xff]  ;;  %v133_v12 = vmul.f32 %v44_v8, %v44_v8  ;;  %v130_v13 = vmul.f32 %v43_v9, %v43_v9  ;;  %v54_v15 = vld [vmem:[#allocation5 + $0x50] sm:$0xff]  ;;  %v48_v18 = vld [vmem:[#allocation5 + $0x20] sm:$0xff]  ;;  %s297_s21 = scalar_lea.vmem %s189_s1, 128  ;;  %p302_p11 = scmp.lt.s32.totalorder %s189_s1, %s189_s1 }
  0x1e   :  { %218 = vmatpush3.msra.mxu0 %v355_v2  ;;  %v47_v14 = vld [vmem:[#allocation5 + $0x18] sm:$0xff]  ;;  %v53_v19 = vld [vmem:[#allocation5 + $0x48] sm:$0xff]  ;;  %v137_v20 = vmul.f32 %v48_v18, %v48_v18  ;;  %v52_v23 = vld [vmem:[#allocation5 + $0x40] sm:$0xff]  ;;  %v143_v36 = vmul.f32 %v54_v15, %v54_v15  ;;  %v144_v38 = vmul.f32 %v55_v10, %v55_v10  ;;  %p298_p10 = scmp.ne.s32.totalorder %s189_s1, %s297_s21  ;;  %p303_p12 = scmp.lt.s32.totalorder %s297_s21, %s297_s21 }
  0x1f   :  { %219 = vmatprep.subr.mxu0 %v327_v0  ;;  %v136_v16 = vmul.f32 %v47_v14, %v47_v14  ;;  %v149_v17 = vadd.f32 %v134_v7, %v133_v12  ;;  %131 = vadd.xlane.f32.xlu0 %v130_v13  ;;  %v49_v22 = vld [vmem:[#allocation5 + $0x28] sm:$0xff]  ;;  %v50_v26 = vld [vmem:[#allocation5 + $0x30] sm:$0xff]  ;;  %v51_v27 = vld [vmem:[#allocation5 + $0x38] sm:$0xff]  ;;  %v141_v32 = vmul.f32 %v52_v23, %v52_v23 }
  0x20   :  { %220 = vmatpush3.msra.mxu0 %v359_v3  ;;  %v138_v24 = vmul.f32 %v49_v22, %v49_v22  ;;  %v139_v28 = vmul.f32 %v50_v26, %v50_v26  ;;  %v140_v30 = vmul.f32 %v51_v27, %v51_v27  ;;  %v142_v34 = vmul.f32 %v53_v19, %v53_v19  ;;  %p304_p13 = por %p303_p12, %p302_p11 }
  0x21   :  { %221 = vmatprep.subr.mxu0 %v327_v0  ;;  %v150_v21 = vadd.f32 %v149_v17, %v135_v11 }
  0x22   :  { %222 = vmatpush3.msra.mxu0 %v56_v4  ;;  %p305_p0 = pnand %p304_p13, %p298_p10 }
  0x23   :  { %223 = vmatprep.subr.mxu0 %v327_v0  ;;  %v151_v25 = vadd.f32 %v150_v21, %v136_v16 }
  0x24   :  { %224 = vmatpush3.msra.mxu0 %v55_v10 }
  0x25   :  { %225 = vmatprep.subr.mxu0 %v327_v0  ;;  %v152_v29 = vadd.f32 %v151_v25, %v137_v20 }
  0x26   :  { %226 = vmatpush3.msra.mxu0 %v54_v15 }
  0x27   :  { %227 = vmatprep.subr.mxu0 %v327_v0  ;;  %v153_v31 = vadd.f32 %v152_v29, %v138_v24 }
  0x28   :  { %228 = vmatpush3.msra.mxu0 %v53_v19 }
  0x29   :  { %229 = vmatprep.subr.mxu0 %v327_v0  ;;  %v154_v33 = vadd.f32 %v153_v31, %v139_v28 }
  0x2a   :  { %230 = vmatpush3.msra.mxu0 %v52_v23 }
  0x2b   :  { %231 = vmatprep.subr.mxu0 %v327_v0  ;;  %v155_v35 = vadd.f32 %v154_v33, %v140_v30 }
  0x2c   :  { %232 = vmatpush3.msra.mxu0 %v51_v27 }
  0x2d   :  { %233 = vmatprep.subr.mxu0 %v327_v0  ;;  %v156_v37 = vadd.f32 %v155_v35, %v141_v32 }
  0x2e   :  { %234 = vmatpush3.msra.mxu0 %v50_v26 }
  0x2f   :  { %235 = vmatprep.subr.mxu0 %v327_v0  ;;  %v157_v39 = vadd.f32 %v156_v37, %v142_v34 }
  0x30   :  { %236 = vmatpush3.msra.mxu0 %v49_v22 }
  0x31   :  { %237 = vmatprep.subr.mxu0 %v327_v0  ;;  %v158_v41 = vadd.f32 %v157_v39, %v143_v36 }
  0x32   :  { %238 = vmatpush3.msra.mxu0 %v48_v18 }
  0x33   :  { %239 = vmatprep.subr.mxu0 %v327_v0  ;;  %v159_v42 = vadd.f32 %v158_v41, %v144_v38 }
  0x34   :  { %240 = vmatpush3.msra.mxu0 %v47_v14 }
  0x35   :  { %241 = vmatprep.subr.mxu0 %v327_v0  ;;  %v160_v43 = vadd.f32 %v159_v42, %v145_v40 }
  0x36   :  { %242 = vmatpush3.msra.mxu0 %v46_v6 }
  0x37   :  { %243 = vmatprep.subr.mxu0 %v327_v0  ;;  %v161_v47 = vadd.f32 %v160_v43, %v146_v44 }
  0x38   :  { %244 = vmatpush3.msra.mxu0 %v363_v5 }
  0x39   :  { %245 = vmatprep.subr.mxu0 %v327_v0  ;;  %v162_v48 = vadd.f32 %v161_v47, %v147_v45 }
  0x3a   :  { %246 = vmatpush3.msra.mxu0 %v44_v8 }
  0x3b   :  { %248 = vmatmul.mubr.f32.vlgmr.msra.gmra.mxu0 %v43_v9  ;;  %v163_v49 = vadd.f32 %v162_v48, %v148_v46 }
  0x3d   :  { %v164_v50 = vrot.slane %v163_v49, 4 }
  0x3f   :  { %v165_v51 = vadd.f32 %v164_v50, %v163_v49 }
  0x41   :  { %v166_v52 = vrot.slane %v165_v51, 2 }
  0x43   :  { %v167_v53 = vadd.f32 %v166_v52, %v165_v51 }
  0x45   :  { %v168_v54 = vrot.slane %v167_v53, 1 }
  0x47   :  { %v169_v58 = vadd.f32 %v168_v54, %v167_v53 }
  0xa8   :  { %v132_v56 = vpop.xlane.xlu0 %131 }
  0xfb   :  { %v126_v55 = vpop.f32.mrf.mxu0 }
  0xfc   :  { %v171_v57 = vmul.f32 2.0, %v126_v55 }
  0xfd   :  { %v249_v59 = vpop.f32.mrf.mxu0 }
  0xfe   :  { %v172_v60 = vsub.f32 %v132_v56, %v171_v57 }
 0x100   :  { %v173_v61 = vadd.f32 %v172_v60, %v169_v58 }
 0x102   :  { %v180_v62 = vmul.f32 -0.03125, %v173_v61 }
 0x104   :  { %181 = vst [vmem:[#allocation7] sm:$0xff] %v180_v62 }
 0x105   :  { %308 = shalt.err (!%p305_p0)
}
 0x106   :  { %191 = dma.vmem_to_hbm [thread:$0]  %s189_s1, 128, %s393_s2, [#allocation4]  }
 0x107   :  { %321 = dma.done.wait [#allocation4], 128  }
 0x108   :  { %322 = vsyncadd [#allocation4], 4294967168 }
 0x109   :  { %195 = vsyncpa [#allocation3], 1 }
 0x10a   :  { %196 = vsyncpa [#allocation6], 1 }
 0x10b   :  { %197 = vsyncpa [#allocation4], 1 }

</bundles_post_ra>
